<compile_context>
chip_gen: v5e
topology: v5e:2x2
jax: 0.10.0
libtpu: 0.0.40
codegen_flags: <defaults>
</compile_context>

<pallas_src>
import functools

import jax
import jax.numpy as jnp
from jax.experimental import pallas as pl
from jax.experimental.pallas import tpu as pltpu


def _self_attention_kernel(x_ref, wqk_ref, bqk_ref, o_ref):
    """One grid step handles a block of `bb` batch elements.

    x_ref  : (bb, T, D)   VMEM, compute dtype (f32 or bf16)
    wqk_ref: (D, 2*Dq)    VMEM, compute dtype; Q half pre-scaled by 1/sqrt(D)
    bqk_ref: (1, 2*Dq)    VMEM, f32;           Q half pre-scaled by 1/sqrt(D)
    o_ref  : (bb, T, T)   VMEM, f32
    """
    bb, t, d = x_ref.shape
    two_dq = wqk_ref.shape[1]
    dq = two_dq // 2

    # Fused Q|K projection: one collapsed MXU matmul over the whole block.
    x2d = x_ref[...].reshape(bb * t, d)
    qk = jnp.dot(x2d, wqk_ref[...], preferred_element_type=jnp.float32)
    qk = (qk + bqk_ref[...]).reshape(bb, t, two_dq)

    # Split the packed projection; cast back to the compute dtype so the score
    # matmul also hits the MXU fast path (accumulation stays f32).
    q = qk[:, :, :dq].astype(x_ref.dtype)
    k = qk[:, :, dq:].astype(x_ref.dtype)

    # Batched scores: contract on the shared Dq axis directly (no k transpose).
    scores = jnp.einsum("bqc,bkc->bqk", q, k,
                        preferred_element_type=jnp.float32)
    o_ref[...] = scores.astype(o_ref.dtype)


@functools.partial(jax.jit, static_argnames=("batch_block", "compute_dtype"))
def self_attention(x, wq, bq, wk, bk, *, batch_block=None,
                   compute_dtype=jnp.float32):
    """x: (B, T, D); wq/wk: (Dq, D); bq/bk: (Dq,). Returns (B, T, T) float32."""
    B, T, D = x.shape
    Dq = wq.shape[0]

    if batch_block is None:
        batch_block = B                     # tiny problem: one grid step total
    assert B % batch_block == 0, (B, batch_block)
    num_blocks = B // batch_block

    # ---- wrapper-side layout / numerics prep (free at the XLA level) ----
    scale = 1.0 / jnp.sqrt(jnp.float32(D))
    # Pre-transpose to (D, Dq), fold the 1/sqrt(D) scale into the Q half only,
    # and pack Q|K side by side along the lane axis -> (D, 2*Dq).
    wqk = jnp.concatenate([wq.T * scale, wk.T], axis=1).astype(compute_dtype)
    bqk = jnp.concatenate([bq * scale, bk], axis=0).reshape(1, 2 * Dq)
    bqk = bqk.astype(jnp.float32)
    xc = x.astype(compute_dtype)

    cost = pl.CostEstimate(
        flops=2 * B * T * D * (2 * Dq) + 2 * B * T * T * Dq,
        transcendentals=0,
        bytes_accessed=(xc.size * xc.dtype.itemsize
                        + wqk.size * wqk.dtype.itemsize
                        + bqk.size * bqk.dtype.itemsize
                        + B * T * T * 4),
    )

    return pl.pallas_call(
        _self_attention_kernel,
        out_shape=jax.ShapeDtypeStruct((B, T, T), jnp.float32),
        grid_spec=pltpu.PrefetchScalarGridSpec(
            num_scalar_prefetch=0,
            grid=(num_blocks,),
            in_specs=[
                pl.BlockSpec((batch_block, T, D), lambda b: (b, 0, 0)),  # x
                pl.BlockSpec((D, 2 * Dq), lambda b: (0, 0)),   # fused W (Q|K)
                pl.BlockSpec((1, 2 * Dq), lambda b: (0, 0)),   # fused bias
            ],
            out_specs=pl.BlockSpec((batch_block, T, T), lambda b: (b, 0, 0)),
        ),
        compiler_params=pltpu.CompilerParams(
            # Batch-block axis stays parallel so v7x's two TensorCores both get
            # work when num_blocks >= 2 (choose batch_block < B there).
            dimension_semantics=("parallel",),
            # Conservative scoped-VMEM budget (safe on v7x's 64 MiB VMEM).
            vmem_limit_bytes=32 * 1024 * 1024,
        ),
        cost_estimate=cost,
    )(xc, wqk, bqk)


def self_attention_ref(x, wq, bq, wk, bk):
    """Pure-JAX reference matching the PyTorch module exactly (f32)."""
    q = jnp.einsum("btd,qd->btq", x, wq) + bq
    k = jnp.einsum("btd,qd->btq", x, wk) + bk
    dot = jnp.einsum("btq,bsq->bts", q, k)
    return dot / jnp.sqrt(jnp.float32(x.shape[-1]))


if __name__ == "__main__":
    # Small shapes consistent with the module: batch=2, seq=8, data_dim=32, dim_q=16
    B, T, D, Dq = 2, 8, 32, 16

    key = jax.random.PRNGKey(0)
    kx, kwq, kbq, kwk, kbk = jax.random.split(key, 5)

    x = jax.random.normal(kx, (B, T, D), dtype=jnp.float32)

    # Deterministic parameter init (mimics nn.Linear's uniform(-1/sqrt(D), 1/sqrt(D))).
    bound = 1.0 / jnp.sqrt(jnp.float32(D))
    wq = jax.random.uniform(kwq, (Dq, D), jnp.float32, -bound, bound)
    bq = jax.random.uniform(kbq, (Dq,), jnp.float32, -bound, bound)
    wk = jax.random.uniform(kwk, (Dq, D), jnp.float32, -bound, bound)
    bk = jax.random.uniform(kbk, (Dq,), jnp.float32, -bound, bound)

    ref = self_attention_ref(x, wq, bq, wk, bk)

    # f32 path (exact module semantics): whole batch in one grid step.
    out = jax.block_until_ready(self_attention(x, wq, bq, wk, bk))
    assert out.shape == (B, T, T), out.shape
    assert jnp.allclose(out, ref, atol=1e-5, rtol=1e-5), \
        float(jnp.max(jnp.abs(out - ref)))

    # bf16-operand path (v6e/v7x MXU fast path, f32 accumulation); also
    # exercises the multi-step parallel grid (one batch element per step).
    out_bf16 = jax.block_until_ready(
        self_attention(x, wq, bq, wk, bk, batch_block=1,
                       compute_dtype=jnp.bfloat16))
    assert out_bf16.shape == (B, T, T), out_bf16.shape
    assert jnp.allclose(out_bf16, ref, atol=1e-1, rtol=1e-1), \
        float(jnp.max(jnp.abs(out_bf16 - ref)))

    print("KERNEL_OK")
</pallas_src>

<mosaic_0001>
module attributes {stable_mosaic.version = 11 : i64} {
  func.func @_self_attention_kernel(%arg0: i32, %arg1: memref<2x8x32xf32, #tpu.memory_space<vmem>>, %arg2: memref<32x32xf32, #tpu.memory_space<vmem>>, %arg3: memref<1x32xf32, #tpu.memory_space<vmem>>, %arg4: memref<2x8x8xf32, #tpu.memory_space<vmem>>) attributes {dimension_semantics = [#tpu.dimension_semantics<parallel>], iteration_bounds = array<i64: 1>, scalar_prefetch = 0 : i64, scratch_operands = 0 : i64, tpu.core_type = #tpu.core_type<tc>, window_params = [{transform_indices = @transform_0, window_bounds = array<i64: 2, 8, 32>}, {pipeline_mode = #tpu.pipeline_mode<synchronous>, transform_indices = @transform_1, window_bounds = array<i64: 32, 32>}, {pipeline_mode = #tpu.pipeline_mode<synchronous>, transform_indices = @transform_2, window_bounds = array<i64: 1, 32>}, {transform_indices = @transform_3, window_bounds = array<i64: 2, 8, 8>}]} {
    %c0 = arith.constant 0 : index
    %c0_0 = arith.constant 0 : index
    %c0_1 = arith.constant 0 : index
    %0 = vector.load %arg1[%c0, %c0_0, %c0_1] : memref<2x8x32xf32, #tpu.memory_space<vmem>>, vector<2x8x32xf32>
    %1 = vector.shape_cast %0 : vector<2x8x32xf32> to vector<16x32xf32>
    %c0_2 = arith.constant 0 : index
    %c0_3 = arith.constant 0 : index
    %2 = vector.load %arg2[%c0_2, %c0_3] : memref<32x32xf32, #tpu.memory_space<vmem>>, vector<32x32xf32>
    %cst = arith.constant dense<0.000000e+00> : vector<16x32xf32>
    %3 = tpu.matmul %1, %2, %cst {dimension_numbers = #tpu.dot_dimension_numbers<[1], [0], [0], [1], [0, 0, 1, 1], [], []>} : vector<16x32xf32>, vector<32x32xf32>, vector<16x32xf32> -> vector<16x32xf32>
    %c0_4 = arith.constant 0 : index
    %c0_5 = arith.constant 0 : index
    %4 = vector.load %arg3[%c0_4, %c0_5] : memref<1x32xf32, #tpu.memory_space<vmem>>, vector<1x32xf32>
    %5 = vector.broadcast %4 : vector<1x32xf32> to vector<16x32xf32>
    %6 = arith.addf %3, %5 : vector<16x32xf32>
    %7 = vector.shape_cast %6 : vector<16x32xf32> to vector<2x8x32xf32>
    %8 = vector.extract_strided_slice %7 {offsets = [0, 0, 0], sizes = [2, 8, 16], strides = [1, 1, 1]} : vector<2x8x32xf32> to vector<2x8x16xf32>
    %9 = vector.extract_strided_slice %7 {offsets = [0, 0, 16], sizes = [2, 8, 16], strides = [1, 1, 1]} : vector<2x8x32xf32> to vector<2x8x16xf32>
    "tpu.trace_start"() <{level = 10 : i32, message = "bqc,bkc->bqk"}> : () -> ()
    %cst_6 = arith.constant dense<0.000000e+00> : vector<2x8x8xf32>
    %10 = tpu.matmul %8, %9, %cst_6 {dimension_numbers = #tpu.dot_dimension_numbers<[2], [2], [1], [1], [0, 0, 0, 1, 1, 1], [0], [0]>} : vector<2x8x16xf32>, vector<2x8x16xf32>, vector<2x8x8xf32> -> vector<2x8x8xf32>
    "tpu.trace_stop"() : () -> ()
    %c0_7 = arith.constant 0 : index
    %c0_8 = arith.constant 0 : index
    %c0_9 = arith.constant 0 : index
    %11 = vector.load %arg4[%c0_7, %c0_8, %c0_9] : memref<2x8x8xf32, #tpu.memory_space<vmem>>, vector<2x8x8xf32>
    tpu.vector_store %arg4[%c0_7, %c0_8, %c0_9], %10 {strides = array<i32>} : memref<2x8x8xf32, #tpu.memory_space<vmem>>, vector<2x8x8xf32>,
    return
  }
  func.func @transform_0(%arg0: i32) -> (i32, i32, i32) {
    %c0_i32 = arith.constant 0 : i32
    %c0_i32_0 = arith.constant 0 : i32
    %c0_i32_1 = arith.constant 0 : i32
    return %arg0, %c0_i32, %c0_i32_0 : i32, i32, i32
  }
  func.func @transform_1(%arg0: i32) -> (i32, i32) {
    %c0_i32 = arith.constant 0 : i32
    %c0_i32_0 = arith.constant 0 : i32
    %c0_i32_1 = arith.constant 0 : i32
    return %c0_i32, %c0_i32_0 : i32, i32
  }
  func.func @transform_2(%arg0: i32) -> (i32, i32) {
    %c0_i32 = arith.constant 0 : i32
    %c0_i32_0 = arith.constant 0 : i32
    %c0_i32_1 = arith.constant 0 : i32
    return %c0_i32, %c0_i32_0 : i32, i32
  }
  func.func @transform_3(%arg0: i32) -> (i32, i32, i32) {
    %c0_i32 = arith.constant 0 : i32
    %c0_i32_0 = arith.constant 0 : i32
    %c0_i32_1 = arith.constant 0 : i32
    return %arg0, %c0_i32, %c0_i32_0 : i32, i32, i32
  }
}

</mosaic_0001>

<bundles_post_ra>
// kernel: self_attention.1
= control target key start
LH: loop header
LB: loop body
LE: loop exit
PB: predicated region body
PF: predicated region fallthrough
CT: control target
= control target key end

     0   :  { %s220_s0 = inlined_call_operand.vmem [shape: f32[2,8,32], index: 0, kind: input, shape index: {}]   ;;  %s221_s1 = inlined_call_operand.vmem [shape: f32[32,32], index: 1, kind: input, shape index: {}]   ;;  %s222_s2 = inlined_call_operand.vmem [shape: f32[1,32], index: 2, kind: input, shape index: {}]   ;;  %s223_s3 = inlined_call_operand.hbm [shape: f32[2,8,8], index: 3, kind: output, shape index: {}]  }
   0x1   :  { %v20_v0 = vld [vmem:[%s221_s1 + $0x18] sm:$0xff]  ;;  %v19_v1 = vld [vmem:[%s221_s1 + $0x10] sm:$0xff]  ;;  %v18_v2 = vld [vmem:[%s221_s1 + $0x8] sm:$0xff] }
   0x2   :  { %137 = vmatpush.msra.mxu3 %v20_v0  ;;  %44 = vmatpush.msra.mxu0 %v20_v0 }
   0x3   :  { %8 = vsyncpa [#allocation3], 0  ;;  %v17_v3 = vld [vmem:[%s221_s1] sm:$0xff]  ;;  %v16_v4 = vld [vmem:[%s220_s0 + $0x8] sm:$0xff]  ;;  %vm25_vm0 = vcmask 261120   ;;  %s172_s1 = smov 112  }
   0x4   :  { %138 = vmatpush.msra.mxu3 %v19_v1  ;;  %45 = vmatpush.msra.mxu0 %v19_v1  ;;  %v15_v5 = vld [vmem:[%s220_s0] sm:$0xff]  ;;  %vm58_vm1 = vcmask 130048   ;;  %s173_s0 = smov [#allocation2]   ;;  %vm110_vm2 = vcmask 64512   ;;  %s174_s29 = smov 128  }
   0x5   :  { %v145_v6 = vld [vmem:[%s222_s2] ss:$0 sm:$0xff]  ;;  %s117_s26 = sshll.u32 %s173_s0, 4  ;;  %s119_s2 = sshll.u32 %s223_s3, 4  ;;  %s118_s26 = int_to_ptr.vmem [resolvable:$true] %s117_s26  ;;  %s120_s2 = int_to_ptr.hbm [resolvable:$true] %s119_s2 }
   0x6   :  { %139 = vmatpush.msra.mxu3 %v18_v2  ;;  %46 = vmatpush.msra.mxu0 %v18_v2  ;;  %s175_s30 = smov 8  }
   0x8   :  { %140 = vmatpush.msra.mxu3 %v17_v3  ;;  %47 = vmatpush.msra.mxu0 %v17_v3 }
   0x9   :  { %132 = vmatmul.msk.f32.vlgmr.msra.gmra.mxu3 %vm25_vm0, %v16_v4  ;;  %131 = vmatmul.msk.f32.vlgmr.msra.gmra.mxu0 %vm25_vm0, %v15_v5 }
  0x86   :  { %v49_v9 = vpop.f32.mrf.mxu0 }
  0x87   :  { %v50_v10 = vadd.f32 %v145_v6, %v49_v9 }
  0x8c   :  { %v52_v7 = vpop.f32.mrf.mxu3 }
  0x8d   :  { %v53_v8 = vadd.f32 %v145_v6, %v52_v7 }
  0x8f   :  { %84 = vrot.lane.b32.xlu0 %v53_v8, %s172_s1 }
  0x97   :  { %56 = vrot.lane.b32.xlu0 %v50_v10, %s172_s1 }
 0x101   :  { %v85_v11 = vpop.permute.xlu0 %84 }
 0x102   :  { %135 = vmatpush.xpose.msk.msra.mxu2 %vm58_vm1, %v85_v11 }
 0x105   :  { %136 = vmatmul.msk.f32.vlgmr.msra.gmra.mxu2 %vm58_vm1, %v53_v8 }
 0x109   :  { %v57_v12 = vpop.permute.xlu0 %56 }
 0x10a   :  { %133 = vmatpush.xpose.msk.msra.mxu1 %vm58_vm1, %v57_v12 }
 0x10d   :  { %134 = vmatmul.msk.f32.vlgmr.msra.gmra.mxu1 %vm58_vm1, %v50_v10 }
 0x188   :  { %v107_v13 = vpop.f32.mrf.mxu2 }
 0x189   :  { %112 = vst.msk [vmem:[#allocation2 + $0x8] sm:$0xff] %vm110_vm2, %v107_v13 }
 0x18a   :  { %v80_v14 = vpop.f32.mrf.mxu1 }
 0x18b   :  { %111 = vst.msk [vmem:[#allocation2] sm:$0xff] %vm110_vm2, %v80_v14 }
 0x18c   :  { %125 = dma.vmem_to_hbm [thread:$0]  %s118_s26, 256, %s120_s2, [#allocation3], %s174_s29, %s174_s29, %s175_s30  }
 0x18d   :  { %170 = dma.done.wait [#allocation3], 256  }
 0x18e   :  { %171 = vsyncadd [#allocation3], 4294967040 }
 0x18f   :  { %130 = vsyncpa [#allocation3], 1 }

</bundles_post_ra>
